<compile_context>
chip_gen: v7x
topology: tpu7x:2x2x1
jax: 0.10.0
libtpu: 0.0.40
codegen_flags: <defaults>
</compile_context>

<pallas_src>
import functools

import numpy as np
import jax
import jax.numpy as jnp
from jax import lax
from jax.experimental import pallas as pl
from jax.experimental.pallas import tpu as pltpu

C_FPN = 256


def _divisor_tile(n, target):
    """Largest t <= min(n, target) dividing n, so grids never have ragged tiles."""
    t = max(1, min(n, target))
    while n % t:
        t -= 1
    return t


# ----------------------------------------------------------------------------
# 1x1 convolution (lateral layer for C5): out[m] = x[m] @ w + b
# M = N*H*W tiled over a parallel grid; bf16 operands, f32 accumulation.
# ----------------------------------------------------------------------------
def _matmul_bias_kernel(x_ref, w_ref, b_ref, o_ref):
    acc = jnp.dot(x_ref[...], w_ref[...], preferred_element_type=jnp.float32)
    o_ref[...] = (acc + b_ref[...]).astype(o_ref.dtype)


def conv1x1(x_nhwc, w, b, *, tm=512):
    N, H, W, Cin = x_nhwc.shape
    Cout = w.shape[1]
    M = N * H * W
    TM = min(M, tm)
    x2 = x_nhwc.reshape(M, Cin)
    out = pl.pallas_call(
        _matmul_bias_kernel,
        out_shape=jax.ShapeDtypeStruct((M, Cout), jnp.float32),
        grid=(pl.cdiv(M, TM),),
        in_specs=[
            pl.BlockSpec((TM, Cin), lambda i: (i, 0)),
            pl.BlockSpec((Cin, Cout), lambda i: (0, 0)),
            pl.BlockSpec((1, Cout), lambda i: (0, 0)),
        ],
        out_specs=pl.BlockSpec((TM, Cout), lambda i: (i, 0)),
        compiler_params=pltpu.CompilerParams(dimension_semantics=("parallel",)),
    )(x2, w, b.reshape(1, Cout))
    return out.reshape(N, H, W, Cout)


# ----------------------------------------------------------------------------
# 3x3 convolution, stride 1, padding 1, optional ReLU (pred layers).
# The zero-padded map is flattened over (row, col) so each of the 9 taps is a
# plain unit-stride 2D slice and every dot has M = TH*(W+2).
# grid = (N, H // TH); one tile of TH output rows per step.
# ----------------------------------------------------------------------------
def _conv3x3_s1_kernel(x_ref, w_ref, b_ref, o_ref, *, TH, W, Wp, relu):
    # x_ref: (1, (Hp+1)*Wp, Cin) bf16 flattened zero-padded map of batch n
    # w_ref: (3, 3, Cin, Cout) bf16 ; b_ref: (1, Cout) f32 ; o_ref: (1, TH, W, Cout) f32
    t = pl.program_id(1)
    TM = TH * Wp
    base = t * TM
    Cout = o_ref.shape[3]
    acc = jnp.zeros((TM, Cout), jnp.float32)
    for ky in range(3):
        for kx in range(3):
            lhs = x_ref[0, pl.ds(base + ky * Wp + kx, TM), :]      # (TM, Cin)
            acc = acc + jnp.dot(lhs, w_ref[ky, kx],
                                preferred_element_type=jnp.float32)
    acc = acc + b_ref[...]
    if relu:
        acc = jnp.maximum(acc, 0.0)
    acc = acc.astype(o_ref.dtype)
    # Flat index r*Wp + w is output (row r, col w); cols W..Wp-1 are junk from
    # the flattened shift and are simply never written.
    for r in range(TH):
        o_ref[0, r] = acc[r * Wp: r * Wp + W]


def conv3x3_s1(x_nhwc, w, b, *, relu=True, target_m=256):
    N, H, W, Cin = x_nhwc.shape
    Cout = w.shape[3]
    Hp, Wp = H + 2, W + 2
    # zero pad (1,1) spatially + one extra bottom row so all tap slices of the
    # flattened map stay in bounds; bf16 cast fused into the same XLA pass.
    xp = jnp.pad(x_nhwc, ((0, 0), (1, 2), (1, 1), (0, 0))).astype(jnp.bfloat16)
    Lp = (Hp + 1) * Wp
    xflat = xp.reshape(N, Lp, Cin)
    TH = _divisor_tile(H, max(1, target_m // Wp))
    kernel = functools.partial(_conv3x3_s1_kernel, TH=TH, W=W, Wp=Wp, relu=relu)
    return pl.pallas_call(
        kernel,
        out_shape=jax.ShapeDtypeStruct((N, H, W, Cout), jnp.float32),
        grid=(N, H // TH),
        in_specs=[
            pl.BlockSpec((1, Lp, Cin), lambda n, t: (n, 0, 0)),
            pl.BlockSpec((3, 3, Cin, Cout), lambda n, t: (0, 0, 0, 0)),
            pl.BlockSpec((1, Cout), lambda n, t: (0, 0)),
        ],
        out_specs=pl.BlockSpec((1, TH, W, Cout), lambda n, t: (n, t, 0, 0)),
        compiler_params=pltpu.CompilerParams(
            dimension_semantics=("parallel", "parallel")),
    )(xflat, w, b.reshape(1, Cout))


# ----------------------------------------------------------------------------
# 3x3 convolution, stride 2, padding 1, ReLU (downsample layers, tiny maps).
# Whole (tiny) output map per grid step; strided column taps are selected with
# a constant one-hot matrix on the MXU (no strided ref slicing).
# ----------------------------------------------------------------------------
def _conv3x3_s2_kernel(x_ref, w_ref, b_ref, sel_ref, o_ref, *, Ho):
    # x_ref: (1, Hp, Wp, Cin) bf16 ; sel_ref: (3, Wo, Wp) bf16 ; o_ref: (1, Ho, Wo, Cout)
    bias = b_ref[...]
    for t in range(Ho):                               # Ho is tiny (<=5 at real FPN sizes)
        acc = jnp.zeros((o_ref.shape[2], o_ref.shape[3]), jnp.float32)
        for ky in range(3):
            row = x_ref[0, 2 * t + ky]                # (Wp, Cin), static index
            for kx in range(3):
                tap = jnp.dot(sel_ref[kx], row)       # (Wo, Cin), exact one-hot select
                acc = acc + jnp.dot(tap, w_ref[ky, kx],
                                    preferred_element_type=jnp.float32)
        # note: ReLU on the downsample outputs matches the reference module
        # (its downsample_layers are Conv2d -> ReLU Sequentials).
        o_ref[0, t] = jnp.maximum(acc + bias, 0.0).astype(o_ref.dtype)


def conv3x3_s2(x_nhwc, w, b):
    N, H, W, Cin = x_nhwc.shape
    Cout = w.shape[3]
    Ho = (H - 1) // 2 + 1
    Wo = (W - 1) // 2 + 1
    Hp, Wp = H + 2, W + 2
    xp = jnp.pad(x_nhwc, ((0, 0), (1, 1), (1, 1), (0, 0))).astype(jnp.bfloat16)
    sel = np.zeros((3, Wo, Wp), np.float32)
    for kx in range(3):
        for j in range(Wo):
            sel[kx, j, kx + 2 * j] = 1.0
    sel = jnp.asarray(sel, jnp.bfloat16)
    kernel = functools.partial(_conv3x3_s2_kernel, Ho=Ho)
    return pl.pallas_call(
        kernel,
        out_shape=jax.ShapeDtypeStruct((N, Ho, Wo, Cout), jnp.float32),
        grid=(N,),
        in_specs=[
            pl.BlockSpec((1, Hp, Wp, Cin), lambda n: (n, 0, 0, 0)),
            pl.BlockSpec((3, 3, Cin, Cout), lambda n: (0, 0, 0, 0)),
            pl.BlockSpec((1, Cout), lambda n: (0, 0)),
            pl.BlockSpec((3, Wo, Wp), lambda n: (0, 0, 0)),
        ],
        out_specs=pl.BlockSpec((1, Ho, Wo, Cout), lambda n: (n, 0, 0, 0)),
        compiler_params=pltpu.CompilerParams(dimension_semantics=("parallel",)),
    )(xp, w, b.reshape(1, Cout), sel)


# ----------------------------------------------------------------------------
# Fused: out = (lateral 1x1 conv of backbone level) + bilinear 2x upsample of
# the coarser pyramid level (align_corners=False, PyTorch semantics).
# Width interpolation uses VPU shift/parity-select on a column-duplicated map;
# row interpolation uses edge-padded row slabs; the lateral conv is one big
# (2*TH*2W, Cin) @ (Cin, 256) bf16 MXU dot per row tile.
# ----------------------------------------------------------------------------
def _upsample_add_lat_kernel(xs_ref, lat_ref, w_ref, b_ref, o_ref, *, TH, W2):
    # xs_ref : (1, H+2, W2+2, C) f32  column-duplicated + edge-padded small map
    # lat_ref: (2*TH*W2, Cin) bf16    flattened lateral pixels for this row tile
    # w_ref  : (Cin, C) bf16 ; b_ref: (1, C) f32 ; o_ref: (1, 2*TH, W2, C) f32
    t = pl.program_id(1)
    r0 = t * TH
    prev = xs_ref[0, pl.ds(r0, TH)]                 # rows r-1 (edge clamped)
    cur = xs_ref[0, pl.ds(r0 + 1, TH)]              # rows r
    nxt = xs_ref[0, pl.ds(r0 + 2, TH)]              # rows r+1 (edge clamped)
    even_h = 0.75 * cur + 0.25 * prev               # output rows 2r
    odd_h = 0.75 * cur + 0.25 * nxt                 # output rows 2r+1
    col = lax.broadcasted_iota(jnp.int32, (1, W2, 1), 1)
    is_even = (col % 2) == 0

    def col_interp(y):                              # y: (TH, W2+2, C)
        return 0.75 * y[:, 1:W2 + 1] + 0.25 * jnp.where(
            is_even, y[:, 0:W2], y[:, 2:W2 + 2])

    up_e = col_interp(even_h)                       # (TH, W2, C)
    up_o = col_interp(odd_h)
    latc = jnp.dot(lat_ref[...], w_ref[...],
                   preferred_element_type=jnp.float32) + b_ref[...]
    for r in range(TH):
        o_ref[0, 2 * r] = (
            up_e[r] + latc[(2 * r) * W2:(2 * r) * W2 + W2]).astype(o_ref.dtype)
        o_ref[0, 2 * r + 1] = (
            up_o[r] + latc[(2 * r + 1) * W2:(2 * r + 1) * W2 + W2]).astype(o_ref.dtype)


def upsample2x_add_lat(x_small, lat_nhwc, w_lat, b_lat, *, target_rows=8):
    """out = (lat_nhwc @ w_lat + b_lat) + bilinear_upsample2x(x_small)."""
    N, H, W, C = x_small.shape
    _, H2, W2, Cin = lat_nhwc.shape
    assert H2 == 2 * H and W2 == 2 * W
    # Nearest column duplication + 1-pixel edge replication (rows & cols) so the
    # kernel only needs unit-stride static slices (layout prep on the small map).
    xs = jnp.repeat(x_small, 2, axis=2)                               # (N, H, 2W, C)
    xs = jnp.concatenate([xs[:, :, :1], xs, xs[:, :, -1:]], axis=2)   # (N, H, 2W+2, C)
    xs = jnp.concatenate([xs[:, :1], xs, xs[:, -1:]], axis=1)         # (N, H+2, 2W+2, C)
    lat_flat = lat_nhwc.reshape(N * H2 * W2, Cin)
    TH = _divisor_tile(H, target_rows)
    ntile = H // TH
    M2 = 2 * TH * W2
    kernel = functools.partial(_upsample_add_lat_kernel, TH=TH, W2=W2)
    return pl.pallas_call(
        kernel,
        out_shape=jax.ShapeDtypeStruct((N, H2, W2, C), jnp.float32),
        grid=(N, ntile),
        in_specs=[
            pl.BlockSpec((1, H + 2, W2 + 2, C), lambda n, t: (n, 0, 0, 0)),
            pl.BlockSpec((M2, Cin), lambda n, t: (n * ntile + t, 0)),
            pl.BlockSpec((Cin, C), lambda n, t: (0, 0)),
            pl.BlockSpec((1, C), lambda n, t: (0, 0)),
        ],
        out_specs=pl.BlockSpec((1, 2 * TH, W2, C), lambda n, t: (n, t, 0, 0)),
        compiler_params=pltpu.CompilerParams(
            dimension_semantics=("parallel", "parallel")),
    )(xs, lat_flat, w_lat, b_lat.reshape(1, C))


# ----------------------------------------------------------------------------
# FPN parameters + forward
# ----------------------------------------------------------------------------
def init_fpn_params(key, in_channels, c=C_FPN):
    keys = iter(jax.random.split(key, 4 * len(in_channels) + 8))
    lat_w = [0.10 * jax.random.normal(next(keys), (cin, c), jnp.float32)
             for cin in in_channels]
    lat_b = [0.10 * jax.random.normal(next(keys), (c,), jnp.float32)
             for _ in in_channels]
    pred_w = [0.05 * jax.random.normal(next(keys), (3, 3, c, c), jnp.float32)
              for _ in in_channels]
    pred_b = [0.10 * jax.random.normal(next(keys), (c,), jnp.float32)
              for _ in in_channels]
    down_w = [0.05 * jax.random.normal(next(keys), (3, 3, c, c), jnp.float32)
              for _ in range(2)]
    down_b = [0.10 * jax.random.normal(next(keys), (c,), jnp.float32)
              for _ in range(2)]
    return dict(lat_w=lat_w, lat_b=lat_b, pred_w=pred_w, pred_b=pred_b,
                down_w=down_w, down_b=down_b)


def fpn_forward(params, backbone_outs_nchw):
    # NCHW (PyTorch convention) -> NHWC bf16 for the MXU kernels (one fused
    # XLA transpose+convert per backbone level).
    # TODO(synk): fold these boundary transposes into the lateral matmuls by
    # contracting over Cin directly on NCHW-blocked inputs.
    c3, c4, c5 = [jnp.transpose(x.astype(jnp.float32), (0, 2, 3, 1)
                                ).astype(jnp.bfloat16)
                  for x in backbone_outs_nchw]
    lat_w = [w.astype(jnp.bfloat16) for w in params['lat_w']]
    pred_w = [w.astype(jnp.bfloat16) for w in params['pred_w']]
    down_w = [w.astype(jnp.bfloat16) for w in params['down_w']]

    p5_1 = conv1x1(c5, lat_w[2], params['lat_b'][2])
    p4_1 = upsample2x_add_lat(p5_1, c4, lat_w[1], params['lat_b'][1])  # lat(c4)+up(p5_1)
    p3_1 = upsample2x_add_lat(p4_1, c3, lat_w[0], params['lat_b'][0])  # lat(c3)+up(p4_1)

    p5 = conv3x3_s1(p5_1, pred_w[2], params['pred_b'][2], relu=True)
    p4 = conv3x3_s1(p4_1, pred_w[1], params['pred_b'][1], relu=True)
    p3 = conv3x3_s1(p3_1, pred_w[0], params['pred_b'][0], relu=True)

    p6 = conv3x3_s2(p5, down_w[0], params['down_b'][0])
    p7 = conv3x3_s2(p6, down_w[1], params['down_b'][1])

    # Back to NCHW to mirror the PyTorch module's outputs.
    return tuple(jnp.transpose(p, (0, 3, 1, 2)) for p in (p3, p4, p5, p6, p7))


if __name__ == "__main__":
    key = jax.random.PRNGKey(0)
    k_p, k3, k4, k5 = jax.random.split(key, 4)

    in_channels = [16, 32, 64]          # backbone channels for C3, C4, C5
    N = 2
    # NCHW backbone feature maps (C3 largest spatial, each level halves H, W)
    c3 = jax.random.normal(k3, (N, in_channels[0], 16, 16), jnp.float32)
    c4 = jax.random.normal(k4, (N, in_channels[1], 8, 8), jnp.float32)
    c5 = jax.random.normal(k5, (N, in_channels[2], 4, 4), jnp.float32)

    params = init_fpn_params(k_p, in_channels)

    outs = fpn_forward(params, [c3, c4, c5])
    outs = jax.block_until_ready(outs)

    expected = [(N, 256, 16, 16), (N, 256, 8, 8), (N, 256, 4, 4),
                (N, 256, 2, 2), (N, 256, 1, 1)]
    assert [tuple(o.shape) for o in outs] == expected, \
        [tuple(o.shape) for o in outs]
    assert all(bool(jnp.all(jnp.isfinite(o))) for o in outs)

    print("KERNEL_OK")
</pallas_src>

<mosaic_0001>
module attributes {stable_mosaic.version = 11 : i64} {
  func.func @_matmul_bias_kernel(%arg0: i32, %arg1: memref<32x64xbf16, #tpu.memory_space<vmem>>, %arg2: memref<64x256xbf16, #tpu.memory_space<vmem>>, %arg3: memref<1x256xf32, #tpu.memory_space<vmem>>, %arg4: memref<32x256xf32, #tpu.memory_space<vmem>>) attributes {dimension_semantics = [#tpu.dimension_semantics<parallel>], iteration_bounds = array<i64: 1>, scalar_prefetch = 0 : i64, scratch_operands = 0 : i64, tpu.core_type = #tpu.core_type<tc>, window_params = [{transform_indices = @transform_0, window_bounds = array<i64: 32, 64>}, {pipeline_mode = #tpu.pipeline_mode<synchronous>, transform_indices = @transform_1, window_bounds = array<i64: 64, 256>}, {pipeline_mode = #tpu.pipeline_mode<synchronous>, transform_indices = @transform_2, window_bounds = array<i64: 1, 256>}, {transform_indices = @transform_3, window_bounds = array<i64: 32, 256>}]} {
    %c0 = arith.constant 0 : index
    %c0_0 = arith.constant 0 : index
    %0 = vector.load %arg1[%c0, %c0_0] : memref<32x64xbf16, #tpu.memory_space<vmem>>, vector<32x64xbf16>
    %c0_1 = arith.constant 0 : index
    %c0_2 = arith.constant 0 : index
    %1 = vector.load %arg2[%c0_1, %c0_2] : memref<64x256xbf16, #tpu.memory_space<vmem>>, vector<64x256xbf16>
    %cst = arith.constant dense<0.000000e+00> : vector<32x256xf32>
    %2 = tpu.matmul %0, %1, %cst {dimension_numbers = #tpu.dot_dimension_numbers<[1], [0], [0], [1], [0, 0, 1, 1], [], []>} : vector<32x64xbf16>, vector<64x256xbf16>, vector<32x256xf32> -> vector<32x256xf32>
    %c0_3 = arith.constant 0 : index
    %c0_4 = arith.constant 0 : index
    %3 = vector.load %arg3[%c0_3, %c0_4] : memref<1x256xf32, #tpu.memory_space<vmem>>, vector<1x256xf32>
    %4 = vector.broadcast %3 : vector<1x256xf32> to vector<32x256xf32>
    %5 = arith.addf %2, %4 : vector<32x256xf32>
    %c0_5 = arith.constant 0 : index
    %c0_6 = arith.constant 0 : index
    %6 = vector.load %arg4[%c0_5, %c0_6] : memref<32x256xf32, #tpu.memory_space<vmem>>, vector<32x256xf32>
    tpu.vector_store %arg4[%c0_5, %c0_6], %5 {strides = array<i32>} : memref<32x256xf32, #tpu.memory_space<vmem>>, vector<32x256xf32>,
    return
  }
  func.func @transform_0(%arg0: i32) -> (i32, i32) {
    %c0_i32 = arith.constant 0 : i32
    %c0_i32_0 = arith.constant 0 : i32
    return %arg0, %c0_i32 : i32, i32
  }
  func.func @transform_1(%arg0: i32) -> (i32, i32) {
    %c0_i32 = arith.constant 0 : i32
    %c0_i32_0 = arith.constant 0 : i32
    %c0_i32_1 = arith.constant 0 : i32
    return %c0_i32, %c0_i32_0 : i32, i32
  }
  func.func @transform_2(%arg0: i32) -> (i32, i32) {
    %c0_i32 = arith.constant 0 : i32
    %c0_i32_0 = arith.constant 0 : i32
    %c0_i32_1 = arith.constant 0 : i32
    return %c0_i32, %c0_i32_0 : i32, i32
  }
  func.func @transform_3(%arg0: i32) -> (i32, i32) {
    %c0_i32 = arith.constant 0 : i32
    %c0_i32_0 = arith.constant 0 : i32
    return %arg0, %c0_i32 : i32, i32
  }
}

</mosaic_0001>

<bundles_post_ra>
// kernel: tpu_custom_call.1
= control target key start
LH: loop header
LB: loop body
LE: loop exit
PB: predicated region body
PF: predicated region fallthrough
CT: control target
= control target key end

     0   :  { %8 = vsyncpa [#allocation3], 0  ;;  %s389_s0 = inlined_call_operand.hbm [shape: bf16[32,64], index: 0, kind: input, shape index: {}]   ;;  %s390_s1 = inlined_call_operand.hbm [shape: bf16[64,256], index: 1, kind: input, shape index: {}]   ;;  %s391_s2 = inlined_call_operand.vmem [shape: f32[1,256], index: 2, kind: input, shape index: {}]   ;;  %s392_s3 = inlined_call_operand.hbm [shape: f32[32,256], index: 3, kind: output, shape index: {}]  }
   0x1   :  { %9 = vsyncpa [#allocation6], 0 }
   0x2   :  { %10 = vsyncpa [#allocation4], 0  ;;  %s320_s12 = smov [#allocation2]   ;;  %s248_s16 = scalar_lea.hbm %s389_s0, 256 }
   0x3   :  { %s16_s13 = sshll.u32 %s320_s12, 4  ;;  %p249_p0 = scmp.ne.s32.totalorder %s389_s0, %s248_s16  ;;  %s17_s13 = int_to_ptr.vmem [resolvable:$true] %s16_s13 }
   0x4   :  { %p252_p1 = scmp.lt.u32.totalorder %s248_s16, %s389_s0 }
   0x6   :  { %p254_p2 = pnand %p252_p1, %p249_p0 }
   0x8   :  { %257 = shalt.err (!%p254_p2)
}
   0x9   :  { %s258_s21 = scalar_lea.vmem %s17_s13, 256  ;;  %p263_p4 = scmp.lt.s32.totalorder %s17_s13, %s17_s13 }
   0xa   :  { %p259_p3 = scmp.ne.s32.totalorder %s17_s13, %s258_s21  ;;  %p264_p5 = scmp.lt.s32.totalorder %s258_s21, %s258_s21 }
   0xc   :  { %p265_p6 = por %p264_p5, %p263_p4 }
   0xe   :  { %p266_p7 = pnand %p265_p6, %p259_p3 }
  0x10   :  { %269 = shalt.err (!%p266_p7)
}
  0x11   :  { %s321_s22 = smov 64   ;;  %s322_s23 = smov 4  }
  0x12   :  { %22 = dma.hbm_to_vmem [thread:$0]  %s389_s0, 256, %s17_s13, [#allocation3], %s321_s22, %s321_s22, %s322_s23  }
  0x13   :  { %s323_s26 = smov [#allocation5]   ;;  %s270_s30 = scalar_lea.hbm %s390_s1, 1024 }
  0x14   :  { %s28_s27 = sshll.u32 %s323_s26, 4  ;;  %p271_p8 = scmp.ne.s32.totalorder %s390_s1, %s270_s30  ;;  %s29_s27 = int_to_ptr.vmem [resolvable:$true] %s28_s27 }
  0x15   :  { %p274_p9 = scmp.lt.u32.totalorder %s270_s30, %s390_s1 }
  0x17   :  { %p276_p10 = pnand %p274_p9, %p271_p8 }
  0x19   :  { %279 = shalt.err (!%p276_p10)
}
  0x1a   :  { %s280_s8 = scalar_lea.vmem %s29_s27, 1024  ;;  %p285_p12 = scmp.lt.s32.totalorder %s29_s27, %s29_s27 }
  0x1b   :  { %p281_p11 = scmp.ne.s32.totalorder %s29_s27, %s280_s8  ;;  %p286_p13 = scmp.lt.s32.totalorder %s280_s8, %s280_s8 }
  0x1d   :  { %p287_p0 = por %p286_p13, %p285_p12 }
  0x1f   :  { %p288_p1 = pnand %p287_p0, %p281_p11 }
  0x21   :  { %291 = shalt.err (!%p288_p1)
}
  0x22   :  { %s324_s0 = smov 128   ;;  %s325_s9 = smov 8  }
  0x23   :  { %34 = dma.hbm_to_vmem [thread:$0]  %s390_s1, 1024, %s29_s27, [#allocation6], %s324_s0, %s324_s0, %s325_s9  }
  0x24   :  { %314 = dma.done.wait [#allocation3], 256  }
  0x25   :  { %315 = vsyncadd [#allocation3], 4294967040 }
  0x26   :  { %316 = dma.done.wait [#allocation6], 1024  }
  0x27   :  { %317 = vsyncadd [#allocation6], 4294966272  ;;  %v326_v0 = vmov 0   ;;  %v234_v1 = vld [vmem:[#allocation5 + $0x4] ss:$8 sps:$4 sm:$0xff]   ;;  %v246_v9 = vld [vmem:[#allocation2] sm:$0xff]   ;;  %v58_v11 = vlaneseq }
  0x28   :  { %157 = vmatprep.mubr.bf16.mxu0 %v326_v0  ;;  %167 = vmatprep.mubr.bf16.mxu1 %v326_v0  ;;  %v236_v2 = vld [vmem:[#allocation5] ss:$8 sps:$4 sm:$0xff]   ;;  %v237_v3 = vld [vmem:[#allocation5 + $0x14] ss:$8 sps:$4 sm:$0xff]   ;;  %v239_v4 = vld [vmem:[#allocation5 + $0x10] ss:$8 sps:$4 sm:$0xff]  }
  0x29   :  { %125 = vmatprep.subr.bf16.mxu0 %v234_v1  ;;  %216 = vmatprep.subr.bf16.mxu1 %v234_v1  ;;  %v240_v5 = vld [vmem:[#allocation5 + $0x24] ss:$8 sps:$4 sm:$0xff]   ;;  %v242_v6 = vld [vmem:[#allocation5 + $0x20] ss:$8 sps:$4 sm:$0xff]   ;;  %v243_v7 = vld [vmem:[#allocation5 + $0x34] ss:$8 sps:$4 sm:$0xff]  }
  0x2a   :  { %126 = vmatpush1.bf16.msra.mxu0 %v236_v2  ;;  %220 = vmatpush1.bf16.msra.mxu1 %v236_v2  ;;  %v245_v8 = vld [vmem:[#allocation5 + $0x30] ss:$8 sps:$4 sm:$0xff]   ;;  %vm118_vm0 = vcmask 523264   ;;  %v59_v12 = vshrl.u32 %v58_v11, 7  ;;  %s327_s13 = smov [#allocation7]  }
  0x2b   :  { %127 = vmatprep.subr.bf16.mxu0 %v237_v3  ;;  %217 = vmatprep.subr.bf16.mxu1 %v237_v3  ;;  %v247_v10 = vld [vmem:[#allocation2 + $0x8] sm:$0xff]   ;;  %v56_v14 = vld [vmem:[%s391_s2] sm:$0x3]  ;;  %s191_s14 = sshll.u32 %s327_s13, 4  ;;  %s192_s14 = int_to_ptr.vmem [resolvable:$true] %s191_s14 }
  0x2c   :  { %v60_v13 = vsub.s32 0, %v59_v12  ;;  %v64_v15 = vsub.s32 1, %v59_v12  ;;  %s292_s2 = scalar_lea.vmem %s192_s14, 1024  ;;  %p297_p3 = scmp.lt.s32.totalorder %s192_s14, %s192_s14 }
  0x2d   :  { %p293_p2 = scmp.ne.s32.totalorder %s192_s14, %s292_s2  ;;  %p298_p4 = scmp.lt.s32.totalorder %s292_s2, %s292_s2 }
  0x2e   :  { %128 = vmatpush1.bf16.msra.mxu0 %v239_v4  ;;  %221 = vmatpush1.bf16.msra.mxu1 %v239_v4  ;;  %v61_v16 = vrot.slane %v56_v14, %v60_v13  ;;  %v65_v17 = vrot.slane %v56_v14, %v64_v15 }
  0x2f   :  { %129 = vmatprep.subr.bf16.mxu0 %v240_v5  ;;  %218 = vmatprep.subr.bf16.mxu1 %v240_v5  ;;  %p299_p5 = por %p298_p4, %p297_p3 }
  0x31   :  { %p300_p6 = pnand %p299_p5, %p293_p2 }
  0x32   :  { %130 = vmatpush1.bf16.msra.mxu0 %v242_v6  ;;  %222 = vmatpush1.bf16.msra.mxu1 %v242_v6 }
  0x33   :  { %131 = vmatprep.subr.bf16.mxu0 %v243_v7  ;;  %219 = vmatprep.subr.bf16.mxu1 %v243_v7 }
  0x36   :  { %132 = vmatpush1.bf16.msra.mxu0 %v245_v8  ;;  %223 = vmatpush1.bf16.msra.mxu1 %v245_v8 }
  0x39   :  { %214 = vmatmul.mubr.msk.bf16.vlgmr.msra.gmra.mrb[0].mxu0 %vm118_vm0, %v246_v9  ;;  %215 = vmatmul.mubr.msk.bf16.vlgmr.msra.gmra.mrb[0].mxu1 %vm118_vm0, %v247_v10 }
 0x10c   :  { %v159_v18 = vpop.f32.mrb[0].mxu0  ;;  %v169_v19 = vpop.f32.mrb[0].mxu1 }
 0x10d   :  { %v160_v20 = vadd.f32 %v159_v18, %v61_v16  ;;  %v170_v21 = vadd.f32 %v169_v19, %v61_v16  ;;  %v161_v22 = vpop.f32.mrb[1].mxu0  ;;  %v171_v23 = vpop.f32.mrb[1].mxu1 }
 0x10e   :  { %v162_v24 = vadd.f32 %v161_v22, %v65_v17  ;;  %v172_v25 = vadd.f32 %v171_v23, %v65_v17  ;;  %v163_v26 = vpop.f32.mrb[2].mxu0  ;;  %v173_v27 = vpop.f32.mrb[2].mxu1 }
 0x10f   :  { %178 = vst [vmem:[#allocation7] sm:$0xff] %v160_v20  ;;  %182 = vst [vmem:[#allocation7 + $0x20] sm:$0xff] %v170_v21  ;;  %v164_v28 = vadd.f32 %v163_v26, %v61_v16  ;;  %v174_v29 = vadd.f32 %v173_v27, %v61_v16  ;;  %v165_v30 = vpop.f32.mrb[3].mxu0  ;;  %v175_v31 = vpop.f32.mrb[3].mxu1 }
 0x110   :  { %179 = vst [vmem:[#allocation7 + $0x8] sm:$0xff] %v162_v24  ;;  %183 = vst [vmem:[#allocation7 + $0x28] sm:$0xff] %v172_v25  ;;  %v166_v32 = vadd.f32 %v165_v30, %v65_v17  ;;  %v176_v33 = vadd.f32 %v175_v31, %v65_v17 }
 0x111   :  { %180 = vst [vmem:[#allocation7 + $0x10] sm:$0xff] %v164_v28  ;;  %184 = vst [vmem:[#allocation7 + $0x30] sm:$0xff] %v174_v29 }
 0x112   :  { %181 = vst [vmem:[#allocation7 + $0x18] sm:$0xff] %v166_v32  ;;  %185 = vst [vmem:[#allocation7 + $0x38] sm:$0xff] %v176_v33 }
 0x113   :  { %303 = shalt.err (!%p300_p6)
}
 0x114   :  { %s304_s17 = scalar_lea.hbm %s392_s3, 1024 }
 0x115   :  { %p305_p7 = scmp.ne.s32.totalorder %s392_s3, %s304_s17  ;;  %p308_p8 = scmp.lt.u32.totalorder %s304_s17, %s392_s3 }
 0x117   :  { %p310_p9 = pnand %p308_p8, %p305_p7 }
 0x119   :  { %313 = shalt.err (!%p310_p9)
}
 0x11a   :  { %s328_s22 = smov 256   ;;  %s329_s23 = smov 16  }
 0x11b   :  { %197 = dma.vmem_to_hbm [thread:$0]  %s192_s14, 1024, %s392_s3, [#allocation4], %s328_s22, %s328_s22, %s329_s23  }
 0x11c   :  { %318 = dma.done.wait [#allocation4], 1024  }
 0x11d   :  { %319 = vsyncadd [#allocation4], 4294966272 }
 0x11e   :  { %201 = vsyncpa [#allocation3], 1 }
 0x11f   :  { %202 = vsyncpa [#allocation6], 1 }
 0x120   :  { %203 = vsyncpa [#allocation4], 1 }

</bundles_post_ra>
